<compile_context>
chip_gen: v7x
topology: tpu7x:2x2x1
jax: 0.10.0
libtpu: 0.0.40
codegen_flags: <defaults>
</compile_context>

<pallas_src>
import functools
import math

import jax
import jax.numpy as jnp
from jax.experimental import pallas as pl
from jax.experimental.pallas import tpu as pltpu

LANE = 128  # lane-dense padded width for the logit output


# ----------------------------- fused Pallas kernel --------------------------

def fused_kernel(qh_ref, qm_ref, kv_ref, kbias_ref,
                 w_q_ref, b_q_ref, w_k_ref, b_k_ref, w_v_ref, b_v_ref,
                 hsum_ref, hsumt_ref, w_o_ref, b_o_ref, w_c_ref, b_c_ref,
                 out_ref, *, batch, n_choices, seq_opt, num_heads):
    # qh_ref:    (B, Sq, H)     question hidden states
    # qm_ref:    (B, Sq, 1)     question attention mask (float, multiplicative)
    # kv_ref:    (B*N*S, H)     option sequences, all batches/choices flattened
    # kbias_ref: (B*N*S, 1)     additive key-padding bias (0 valid / -1e30 pad)
    # w_q/k/v:   (H, H)         pre-transposed projection weights
    # b_q/k/v:   (1, H)
    # hsum_ref:  (H, NH)        one-hot head membership * (1/sqrt(dh))
    # hsumt_ref: (NH, H)        unscaled one-hot head membership, transposed
    # w_o_ref:   (H, H)         pre-transposed out-projection;  b_o_ref: (1, H)
    # w_c_ref:   (H, 128)       classifier weight padded to 128 lanes
    # b_c_ref:   (1, 128)       classifier bias padded to 128 lanes
    # out_ref:   (B*N, 128)     lane-dense logits (logit in lane 0 of each row)
    B, N, S, NH = batch, n_choices, seq_opt, num_heads
    NS = N * S
    H = w_q_ref.shape[0]
    cdt = w_q_ref.dtype  # matmul operand dtype (f32 toy, bf16 at realistic H)

    qh = qh_ref[...]
    qm = qm_ref[...]
    kv = kv_ref[...]
    kbias = kbias_ref[...]

    # ---- masked mean pooling of the question (q_embed never leaves vregs) ----
    qsum = jnp.sum(qh.astype(jnp.float32) * qm, axis=1)              # (B, H)
    qcnt = jnp.maximum(jnp.sum(qm, axis=1), 1e-9)                    # (B, 1)
    q_embed = qsum / qcnt                                            # exact divide
    # dropout -> identity (eval)

    # ---- split in-projections: no concat, no broadcast, no misaligned slices ----
    qp = jnp.dot(q_embed.astype(cdt), w_q_ref[...],
                 preferred_element_type=jnp.float32) + b_q_ref[...]      # (B, H)
    kp = jnp.dot(kv, w_k_ref[...],
                 preferred_element_type=jnp.float32) + b_k_ref[...]      # (BNS, H)
    vp = jnp.dot(kv, w_v_ref[...],
                 preferred_element_type=jnp.float32) + b_v_ref[...]      # (BNS, H)

    # ---- per-head scores for the single query row of each (batch, choice) ----
    # scores[r, h] = (1/sqrt(dh)) * sum_{d in head h} qp[b(r), d] * kp[r, d]
    prod = (kp.reshape(B, NS, H) * qp[:, None, :]).reshape(B * NS, H)
    scores = jnp.dot(prod, hsum_ref[...],
                     preferred_element_type=jnp.float32)                 # (BNS, NH)
    scores = scores + kbias                                              # key-padding mask

    # ---- softmax over the key axis per (batch*choice, head), exact divide ----
    s3 = scores.reshape(B * N, S, NH)
    mx = jnp.max(s3, axis=1, keepdims=True)
    e = jnp.exp(s3 - mx)
    denom = jnp.sum(e, axis=1, keepdims=True)
    p = (e / denom).reshape(B * NS, NH)

    # ---- weighted value sum per (batch, choice) ----
    p_full = jnp.dot(p, hsumt_ref[...],
                     preferred_element_type=jnp.float32)                 # (BNS, H)
    attn = jnp.sum((p_full * vp).reshape(B * N, S, H), axis=1)           # (B*N, H)
    # dropout -> identity (eval)

    # ---- out-projection + classifier head (lane-dense padded logits) ----
    out = jnp.dot(attn.astype(cdt), w_o_ref[...],
                  preferred_element_type=jnp.float32) + b_o_ref[...]     # (B*N, H)
    logits = jnp.dot(out.astype(cdt), w_c_ref[...],
                     preferred_element_type=jnp.float32) + b_c_ref[...]  # (B*N, 128)
    out_ref[...] = logits.astype(out_ref.dtype)


# --------------------- deterministic synthetic "encoder" -------------------
# TODO(synk): self.encoder is AutoModel.from_pretrained(...); a full RoBERTa
# has no clean single-kernel Pallas equivalent here, so it is replaced by a
# deterministic embedding-lookup encoder (plain-JAX glue).

def synthetic_encoder(input_ids, emb_table, pos_table):
    emb = emb_table[input_ids]                     # (B, S, H)
    pos = pos_table[: input_ids.shape[1]][None]    # (1, S, H)
    return jnp.tanh(emb + pos)


# ----------------------------- full forward --------------------------------

def forward(q_input_ids, q_attention_mask, opt_input_ids, opt_attention_mask,
            params, hidden_size, num_heads, compute_dtype=jnp.float32):
    B, N, S_opt = opt_input_ids.shape
    H = hidden_size
    NH = num_heads
    dh = H // NH
    NS = N * S_opt
    BNS = B * NS

    # ----- encoder glue (plain JAX) -----
    q_hidden = synthetic_encoder(q_input_ids, params["emb"], params["pos"])   # (B, Sq, H)
    Sq = q_hidden.shape[1]
    opt_seq = synthetic_encoder(opt_input_ids.reshape(B * N, S_opt),
                                params["emb"], params["pos"])                 # (B*N, S, H)

    q_hidden = q_hidden.astype(compute_dtype)
    kv = opt_seq.reshape(BNS, H).astype(compute_dtype)                        # (B*N*S, H)

    q_mask = q_attention_mask.astype(jnp.float32).reshape(B, Sq, 1)           # (B, Sq, 1)
    # key-padding mask as an additive bias: 0 where valid, -1e30 where padded
    kbias = ((opt_attention_mask.astype(jnp.float32) - 1.0) * 1e30).reshape(BNS, 1)

    # ----- one-time weight packing in the wrapper -----
    w_q_t = params["w_in"][0].T.astype(compute_dtype)                         # (H, H)
    w_k_t = params["w_in"][1].T.astype(compute_dtype)
    w_v_t = params["w_in"][2].T.astype(compute_dtype)
    b_q = params["b_in"][0].reshape(1, H).astype(jnp.float32)
    b_k = params["b_in"][1].reshape(1, H).astype(jnp.float32)
    b_v = params["b_in"][2].reshape(1, H).astype(jnp.float32)
    w_o_t = params["w_o"].T.astype(compute_dtype)                             # (H, H)
    b_o = params["b_o"].reshape(1, H).astype(jnp.float32)
    w_c_pad = jnp.zeros((H, LANE), compute_dtype).at[:, 0:1].set(
        params["w_c"].T.astype(compute_dtype))                                # (H, 128)
    b_c_pad = jnp.zeros((1, LANE), jnp.float32).at[0, 0].set(params["b_c"][0])

    # one-hot head membership; the 1/sqrt(dh) score scale is folded into the
    # score-side copy so it rides along in the MXU matmul.
    base = (jnp.arange(H)[:, None] // dh ==
            jnp.arange(NH)[None, :]).astype(jnp.float32)                      # (H, NH)
    hsum = base * (1.0 / math.sqrt(dh))                                       # scaled
    hsum_t = base.T                                                           # (NH, H), unscaled

    kernel = functools.partial(fused_kernel, batch=B, n_choices=N,
                               seq_opt=S_opt, num_heads=NH)

    # Single grid step: all batches/choices fit comfortably in VMEM at these
    # sizes, and v5e/v6e have one TensorCore so a multi-step grid only adds
    # per-step pipeline overhead.  (Realistic sizes on v7x: grid=(B, N) with
    # per-choice kv tiles, bf16 operands, Buffered(1) weights.)
    out = pl.pallas_call(
        kernel,
        out_shape=jax.ShapeDtypeStruct((B * N, LANE), jnp.float32),
        grid=(1,),
        in_specs=[
            pl.BlockSpec((B, Sq, H), lambda i: (0, 0, 0)),   # question hidden
            pl.BlockSpec((B, Sq, 1), lambda i: (0, 0, 0)),   # question mask
            pl.BlockSpec((BNS, H), lambda i: (0, 0)),        # option sequences (flat)
            pl.BlockSpec((BNS, 1), lambda i: (0, 0)),        # additive key-padding bias
            pl.BlockSpec((H, H), lambda i: (0, 0)),          # Wq^T
            pl.BlockSpec((1, H), lambda i: (0, 0)),          # bq
            pl.BlockSpec((H, H), lambda i: (0, 0)),          # Wk^T
            pl.BlockSpec((1, H), lambda i: (0, 0)),          # bk
            pl.BlockSpec((H, H), lambda i: (0, 0)),          # Wv^T
            pl.BlockSpec((1, H), lambda i: (0, 0)),          # bv
            pl.BlockSpec((H, NH), lambda i: (0, 0)),         # head one-hot * scale
            pl.BlockSpec((NH, H), lambda i: (0, 0)),         # head one-hot^T
            pl.BlockSpec((H, H), lambda i: (0, 0)),          # Wo^T
            pl.BlockSpec((1, H), lambda i: (0, 0)),          # bo
            pl.BlockSpec((H, LANE), lambda i: (0, 0)),       # classifier W^T (padded)
            pl.BlockSpec((1, LANE), lambda i: (0, 0)),       # classifier bias (padded)
        ],
        out_specs=pl.BlockSpec((B * N, LANE), lambda i: (0, 0)),
        compiler_params=pltpu.CompilerParams(dimension_semantics=("arbitrary",)),
    )(q_hidden, q_mask, kv, kbias,
      w_q_t, b_q, w_k_t, b_k, w_v_t, b_v,
      hsum, hsum_t, w_o_t, b_o, w_c_pad, b_c_pad)

    return out[:, 0].reshape(B, N)


# ----------------------------- pure-JAX reference ---------------------------

def reference_forward(q_input_ids, q_attention_mask, opt_input_ids, opt_attention_mask,
                      params, hidden_size, num_heads):
    B, N, S_opt = opt_input_ids.shape
    H = hidden_size
    dh = H // num_heads

    q_hidden = synthetic_encoder(q_input_ids, params["emb"], params["pos"])
    qm = q_attention_mask.astype(jnp.float32)
    summed = jnp.sum(q_hidden * qm[:, :, None], axis=1)
    denom = jnp.maximum(jnp.sum(qm, axis=1, keepdims=True), 1e-9)
    q_embed = summed / denom

    opt_ids_flat = opt_input_ids.reshape(B * N, S_opt)
    opt_mask_flat = opt_attention_mask.reshape(B * N, S_opt).astype(jnp.float32)
    opt_sequence = synthetic_encoder(opt_ids_flat, params["emb"], params["pos"])

    q_rep = jnp.repeat(q_embed[:, None, :], N, axis=1).reshape(B * N, 1, H)

    wq, wk, wv = params["w_in"][0], params["w_in"][1], params["w_in"][2]
    bq, bk, bv = params["b_in"][0], params["b_in"][1], params["b_in"][2]
    qp = q_rep @ wq.T + bq
    kp = opt_sequence @ wk.T + bk
    vp = opt_sequence @ wv.T + bv

    BN = B * N
    qh = qp.reshape(BN, 1, num_heads, dh).transpose(0, 2, 1, 3)
    kh = kp.reshape(BN, S_opt, num_heads, dh).transpose(0, 2, 1, 3)
    vh = vp.reshape(BN, S_opt, num_heads, dh).transpose(0, 2, 1, 3)

    scores = jnp.einsum("bhqd,bhkd->bhqk", qh, kh) / math.sqrt(dh)
    valid = opt_mask_flat[:, None, None, :] > 0
    scores = jnp.where(valid, scores, -jnp.inf)
    p = jax.nn.softmax(scores, axis=-1)
    a = jnp.einsum("bhqk,bhkd->bhqd", p, vh)
    a = a.transpose(0, 2, 1, 3).reshape(BN, 1, H)
    out = a @ params["w_o"].T + params["b_o"]
    logits = out[:, 0, :] @ params["w_c"].T + params["b_c"]
    return logits.reshape(B, N)


# --------------------------------- main ------------------------------------

if __name__ == "__main__":
    B, N_CHOICES = 2, 2
    SEQ_Q, SEQ_OPT = 8, 8
    HIDDEN, NUM_HEADS = 32, 8
    VOCAB = 50

    key = jax.random.PRNGKey(0)
    keys = jax.random.split(key, 10)

    # deterministic parameters (torch-like orientation)
    params = {
        "emb": 0.1 * jax.random.normal(keys[0], (VOCAB, HIDDEN), jnp.float32),
        "pos": 0.05 * jax.random.normal(keys[1], (max(SEQ_Q, SEQ_OPT), HIDDEN), jnp.float32),
        "w_in": 0.05 * jax.random.normal(keys[2], (3, HIDDEN, HIDDEN), jnp.float32),
        "b_in": 0.01 * jax.random.normal(keys[3], (3, HIDDEN), jnp.float32),
        "w_o": 0.05 * jax.random.normal(keys[4], (HIDDEN, HIDDEN), jnp.float32),
        "b_o": 0.01 * jax.random.normal(keys[5], (HIDDEN,), jnp.float32),
        "w_c": 0.05 * jax.random.normal(keys[6], (1, HIDDEN), jnp.float32),
        "b_c": 0.01 * jax.random.normal(keys[7], (1,), jnp.float32),
    }

    # deterministic inputs
    q_input_ids = jax.random.randint(keys[8], (B, SEQ_Q), 0, VOCAB, dtype=jnp.int32)
    opt_input_ids = jax.random.randint(keys[9], (B, N_CHOICES, SEQ_OPT), 0, VOCAB, dtype=jnp.int32)
    # attention masks: first tokens valid, trailing tokens padded
    q_attention_mask = (jnp.arange(SEQ_Q)[None, :] <
                        jnp.array([[SEQ_Q], [SEQ_Q - 2]])).astype(jnp.int32)
    opt_lens = jnp.array([[SEQ_OPT, SEQ_OPT - 1], [SEQ_OPT - 3, SEQ_OPT]])
    opt_attention_mask = (jnp.arange(SEQ_OPT)[None, None, :] <
                          opt_lens[:, :, None]).astype(jnp.int32)

    # f32 at toy H=32; use compute_dtype=jnp.bfloat16 at realistic H (768/1024)
    logits = forward(q_input_ids, q_attention_mask, opt_input_ids, opt_attention_mask,
                     params, HIDDEN, NUM_HEADS, compute_dtype=jnp.float32)
    logits = jax.block_until_ready(logits)

    ref = reference_forward(q_input_ids, q_attention_mask, opt_input_ids, opt_attention_mask,
                            params, HIDDEN, NUM_HEADS)
    ref = jax.block_until_ready(ref)

    assert logits.shape == (B, N_CHOICES)
    assert bool(jnp.all(jnp.abs(logits - ref) < 1e-2)), (logits, ref)
    print("KERNEL_OK")
</pallas_src>

<mosaic_0001>
module attributes {stable_mosaic.version = 11 : i64} {
  func.func @fused_kernel(%arg0: i32, %arg1: memref<2x8x32xf32, #tpu.memory_space<vmem>>, %arg2: memref<2x8x1xf32, #tpu.memory_space<vmem>>, %arg3: memref<32x32xf32, #tpu.memory_space<vmem>>, %arg4: memref<32x1xf32, #tpu.memory_space<vmem>>, %arg5: memref<32x32xf32, #tpu.memory_space<vmem>>, %arg6: memref<1x32xf32, #tpu.memory_space<vmem>>, %arg7: memref<32x32xf32, #tpu.memory_space<vmem>>, %arg8: memref<1x32xf32, #tpu.memory_space<vmem>>, %arg9: memref<32x32xf32, #tpu.memory_space<vmem>>, %arg10: memref<1x32xf32, #tpu.memory_space<vmem>>, %arg11: memref<32x8xf32, #tpu.memory_space<vmem>>, %arg12: memref<8x32xf32, #tpu.memory_space<vmem>>, %arg13: memref<32x32xf32, #tpu.memory_space<vmem>>, %arg14: memref<1x32xf32, #tpu.memory_space<vmem>>, %arg15: memref<32x128xf32, #tpu.memory_space<vmem>>, %arg16: memref<1x128xf32, #tpu.memory_space<vmem>>, %arg17: memref<4x128xf32, #tpu.memory_space<vmem>>) attributes {dimension_semantics = [#tpu.dimension_semantics<arbitrary>], iteration_bounds = array<i64: 1>, scalar_prefetch = 0 : i64, scratch_operands = 0 : i64, tpu.core_type = #tpu.core_type<tc>, window_params = [{pipeline_mode = #tpu.pipeline_mode<synchronous>, transform_indices = @transform_0, window_bounds = array<i64: 2, 8, 32>}, {pipeline_mode = #tpu.pipeline_mode<synchronous>, transform_indices = @transform_1, window_bounds = array<i64: 2, 8, 1>}, {pipeline_mode = #tpu.pipeline_mode<synchronous>, transform_indices = @transform_2, window_bounds = array<i64: 32, 32>}, {pipeline_mode = #tpu.pipeline_mode<synchronous>, transform_indices = @transform_3, window_bounds = array<i64: 32, 1>}, {pipeline_mode = #tpu.pipeline_mode<synchronous>, transform_indices = @transform_4, window_bounds = array<i64: 32, 32>}, {pipeline_mode = #tpu.pipeline_mode<synchronous>, transform_indices = @transform_5, window_bounds = array<i64: 1, 32>}, {pipeline_mode = #tpu.pipeline_mode<synchronous>, transform_indices = @transform_6, window_bounds = array<i64: 32, 32>}, {pipeline_mode = #tpu.pipeline_mode<synchronous>, transform_indices = @transform_7, window_bounds = array<i64: 1, 32>}, {pipeline_mode = #tpu.pipeline_mode<synchronous>, transform_indices = @transform_8, window_bounds = array<i64: 32, 32>}, {pipeline_mode = #tpu.pipeline_mode<synchronous>, transform_indices = @transform_9, window_bounds = array<i64: 1, 32>}, {pipeline_mode = #tpu.pipeline_mode<synchronous>, transform_indices = @transform_10, window_bounds = array<i64: 32, 8>}, {pipeline_mode = #tpu.pipeline_mode<synchronous>, transform_indices = @transform_11, window_bounds = array<i64: 8, 32>}, {pipeline_mode = #tpu.pipeline_mode<synchronous>, transform_indices = @transform_12, window_bounds = array<i64: 32, 32>}, {pipeline_mode = #tpu.pipeline_mode<synchronous>, transform_indices = @transform_13, window_bounds = array<i64: 1, 32>}, {pipeline_mode = #tpu.pipeline_mode<synchronous>, transform_indices = @transform_14, window_bounds = array<i64: 32, 128>}, {pipeline_mode = #tpu.pipeline_mode<synchronous>, transform_indices = @transform_15, window_bounds = array<i64: 1, 128>}, {pipeline_mode = #tpu.pipeline_mode<synchronous>, transform_indices = @transform_16, window_bounds = array<i64: 4, 128>}]} {
    %c0 = arith.constant 0 : index
    %c0_0 = arith.constant 0 : index
    %c0_1 = arith.constant 0 : index
    %0 = vector.load %arg1[%c0, %c0_0, %c0_1] : memref<2x8x32xf32, #tpu.memory_space<vmem>>, vector<2x8x32xf32>
    %c0_2 = arith.constant 0 : index
    %c0_3 = arith.constant 0 : index
    %c0_4 = arith.constant 0 : index
    %1 = vector.load %arg2[%c0_2, %c0_3, %c0_4] : memref<2x8x1xf32, #tpu.memory_space<vmem>>, vector<2x8x1xf32>
    %c0_5 = arith.constant 0 : index
    %c0_6 = arith.constant 0 : index
    %2 = vector.load %arg3[%c0_5, %c0_6] : memref<32x32xf32, #tpu.memory_space<vmem>>, vector<32x32xf32>
    %c0_7 = arith.constant 0 : index
    %c0_8 = arith.constant 0 : index
    %3 = vector.load %arg4[%c0_7, %c0_8] : memref<32x1xf32, #tpu.memory_space<vmem>>, vector<32x1xf32>
    %4 = vector.broadcast %1 : vector<2x8x1xf32> to vector<2x8x32xf32>
    %5 = arith.mulf %0, %4 : vector<2x8x32xf32>
    %cst = arith.constant dense<0.000000e+00> : vector<2x32xf32>
    %6 = vector.multi_reduction <add>, %5, %cst [1] : vector<2x8x32xf32> to vector<2x32xf32>
    %cst_9 = arith.constant dense<0.000000e+00> : vector<2x1xf32>
    %7 = vector.multi_reduction <add>, %1, %cst_9 [1] : vector<2x8x1xf32> to vector<2x1xf32>
    %cst_10 = arith.constant 9.99999971E-10 : f32
    %8 = vector.broadcast %cst_10 : f32 to vector<2x1xf32>
    %9 = arith.maximumf %7, %8 : vector<2x1xf32>
    %10 = vector.broadcast %9 : vector<2x1xf32> to vector<2x32xf32>
    %11 = arith.divf %6, %10 : vector<2x32xf32>
    %c0_11 = arith.constant 0 : index
    %c0_12 = arith.constant 0 : index
    %12 = vector.load %arg5[%c0_11, %c0_12] : memref<32x32xf32, #tpu.memory_space<vmem>>, vector<32x32xf32>
    %cst_13 = arith.constant dense<0.000000e+00> : vector<2x32xf32>
    %13 = tpu.matmul %11, %12, %cst_13 {dimension_numbers = #tpu.dot_dimension_numbers<[1], [0], [0], [1], [0, 0, 1, 1], [], []>} : vector<2x32xf32>, vector<32x32xf32>, vector<2x32xf32> -> vector<2x32xf32>
    %c0_14 = arith.constant 0 : index
    %c0_15 = arith.constant 0 : index
    %14 = vector.load %arg6[%c0_14, %c0_15] : memref<1x32xf32, #tpu.memory_space<vmem>>, vector<1x32xf32>
    %15 = vector.broadcast %14 : vector<1x32xf32> to vector<2x32xf32>
    %16 = arith.addf %13, %15 : vector<2x32xf32>
    %c0_16 = arith.constant 0 : index
    %c0_17 = arith.constant 0 : index
    %17 = vector.load %arg7[%c0_16, %c0_17] : memref<32x32xf32, #tpu.memory_space<vmem>>, vector<32x32xf32>
    %cst_18 = arith.constant dense<0.000000e+00> : vector<32x32xf32>
    %18 = tpu.matmul %2, %17, %cst_18 {dimension_numbers = #tpu.dot_dimension_numbers<[1], [0], [0], [1], [0, 0, 1, 1], [], []>} : vector<32x32xf32>, vector<32x32xf32>, vector<32x32xf32> -> vector<32x32xf32>
    %c0_19 = arith.constant 0 : index
    %c0_20 = arith.constant 0 : index
    %19 = vector.load %arg8[%c0_19, %c0_20] : memref<1x32xf32, #tpu.memory_space<vmem>>, vector<1x32xf32>
    %20 = vector.broadcast %19 : vector<1x32xf32> to vector<32x32xf32>
    %21 = arith.addf %18, %20 : vector<32x32xf32>
    %c0_21 = arith.constant 0 : index
    %c0_22 = arith.constant 0 : index
    %22 = vector.load %arg9[%c0_21, %c0_22] : memref<32x32xf32, #tpu.memory_space<vmem>>, vector<32x32xf32>
    %cst_23 = arith.constant dense<0.000000e+00> : vector<32x32xf32>
    %23 = tpu.matmul %2, %22, %cst_23 {dimension_numbers = #tpu.dot_dimension_numbers<[1], [0], [0], [1], [0, 0, 1, 1], [], []>} : vector<32x32xf32>, vector<32x32xf32>, vector<32x32xf32> -> vector<32x32xf32>
    %c0_24 = arith.constant 0 : index
    %c0_25 = arith.constant 0 : index
    %24 = vector.load %arg10[%c0_24, %c0_25] : memref<1x32xf32, #tpu.memory_space<vmem>>, vector<1x32xf32>
    %25 = vector.broadcast %24 : vector<1x32xf32> to vector<32x32xf32>
    %26 = arith.addf %23, %25 : vector<32x32xf32>
    %27 = vector.shape_cast %21 : vector<32x32xf32> to vector<2x16x32xf32>
    %28 = vector.shape_cast %16 : vector<2x32xf32> to vector<2x1x32xf32>
    %29 = vector.broadcast %28 : vector<2x1x32xf32> to vector<2x16x32xf32>
    %30 = arith.mulf %27, %29 : vector<2x16x32xf32>
    %31 = vector.shape_cast %30 : vector<2x16x32xf32> to vector<32x32xf32>
    %c0_26 = arith.constant 0 : index
    %c0_27 = arith.constant 0 : index
    %32 = vector.load %arg11[%c0_26, %c0_27] : memref<32x8xf32, #tpu.memory_space<vmem>>, vector<32x8xf32>
    %cst_28 = arith.constant dense<0.000000e+00> : vector<32x8xf32>
    %33 = tpu.matmul %31, %32, %cst_28 {dimension_numbers = #tpu.dot_dimension_numbers<[1], [0], [0], [1], [0, 0, 1, 1], [], []>} : vector<32x32xf32>, vector<32x8xf32>, vector<32x8xf32> -> vector<32x8xf32>
    %34 = vector.broadcast %3 : vector<32x1xf32> to vector<32x8xf32>
    %35 = arith.addf %33, %34 : vector<32x8xf32>
    %36 = vector.shape_cast %35 : vector<32x8xf32> to vector<4x8x8xf32>
    %cst_29 = arith.constant dense<0xFF800000> : vector<4x8xf32>
    %37 = vector.multi_reduction <maximumf>, %36, %cst_29 [1] : vector<4x8x8xf32> to vector<4x8xf32>
    %38 = vector.shape_cast %37 : vector<4x8xf32> to vector<4x1x8xf32>
    %39 = vector.broadcast %38 : vector<4x1x8xf32> to vector<4x8x8xf32>
    %40 = arith.subf %36, %39 : vector<4x8x8xf32>
    %41 = math.exp %40 : vector<4x8x8xf32>
    %cst_30 = arith.constant dense<0.000000e+00> : vector<4x8xf32>
    %42 = vector.multi_reduction <add>, %41, %cst_30 [1] : vector<4x8x8xf32> to vector<4x8xf32>
    %43 = vector.shape_cast %42 : vector<4x8xf32> to vector<4x1x8xf32>
    %44 = vector.broadcast %43 : vector<4x1x8xf32> to vector<4x8x8xf32>
    %45 = arith.divf %41, %44 : vector<4x8x8xf32>
    %46 = vector.shape_cast %45 : vector<4x8x8xf32> to vector<32x8xf32>
    %c0_31 = arith.constant 0 : index
    %c0_32 = arith.constant 0 : index
    %47 = vector.load %arg12[%c0_31, %c0_32] : memref<8x32xf32, #tpu.memory_space<vmem>>, vector<8x32xf32>
    %cst_33 = arith.constant dense<0.000000e+00> : vector<32x32xf32>
    %48 = tpu.matmul %46, %47, %cst_33 {dimension_numbers = #tpu.dot_dimension_numbers<[1], [0], [0], [1], [0, 0, 1, 1], [], []>} : vector<32x8xf32>, vector<8x32xf32>, vector<32x32xf32> -> vector<32x32xf32>
    %49 = arith.mulf %48, %26 : vector<32x32xf32>
    %50 = vector.shape_cast %49 : vector<32x32xf32> to vector<4x8x32xf32>
    %cst_34 = arith.constant dense<0.000000e+00> : vector<4x32xf32>
    %51 = vector.multi_reduction <add>, %50, %cst_34 [1] : vector<4x8x32xf32> to vector<4x32xf32>
    %c0_35 = arith.constant 0 : index
    %c0_36 = arith.constant 0 : index
    %52 = vector.load %arg13[%c0_35, %c0_36] : memref<32x32xf32, #tpu.memory_space<vmem>>, vector<32x32xf32>
    %cst_37 = arith.constant dense<0.000000e+00> : vector<4x32xf32>
    %53 = tpu.matmul %51, %52, %cst_37 {dimension_numbers = #tpu.dot_dimension_numbers<[1], [0], [0], [1], [0, 0, 1, 1], [], []>} : vector<4x32xf32>, vector<32x32xf32>, vector<4x32xf32> -> vector<4x32xf32>
    %c0_38 = arith.constant 0 : index
    %c0_39 = arith.constant 0 : index
    %54 = vector.load %arg14[%c0_38, %c0_39] : memref<1x32xf32, #tpu.memory_space<vmem>>, vector<1x32xf32>
    %55 = vector.broadcast %54 : vector<1x32xf32> to vector<4x32xf32>
    %56 = arith.addf %53, %55 : vector<4x32xf32>
    %c0_40 = arith.constant 0 : index
    %c0_41 = arith.constant 0 : index
    %57 = vector.load %arg15[%c0_40, %c0_41] : memref<32x128xf32, #tpu.memory_space<vmem>>, vector<32x128xf32>
    %cst_42 = arith.constant dense<0.000000e+00> : vector<4x128xf32>
    %58 = tpu.matmul %56, %57, %cst_42 {dimension_numbers = #tpu.dot_dimension_numbers<[1], [0], [0], [1], [0, 0, 1, 1], [], []>} : vector<4x32xf32>, vector<32x128xf32>, vector<4x128xf32> -> vector<4x128xf32>
    %c0_43 = arith.constant 0 : index
    %c0_44 = arith.constant 0 : index
    %59 = vector.load %arg16[%c0_43, %c0_44] : memref<1x128xf32, #tpu.memory_space<vmem>>, vector<1x128xf32>
    %60 = vector.broadcast %59 : vector<1x128xf32> to vector<4x128xf32>
    %61 = arith.addf %58, %60 : vector<4x128xf32>
    %c0_45 = arith.constant 0 : index
    %c0_46 = arith.constant 0 : index
    %62 = vector.load %arg17[%c0_45, %c0_46] : memref<4x128xf32, #tpu.memory_space<vmem>>, vector<4x128xf32>
    tpu.vector_store %arg17[%c0_45, %c0_46], %61 {strides = array<i32>} : memref<4x128xf32, #tpu.memory_space<vmem>>, vector<4x128xf32>,
    return
  }
  func.func @transform_0(%arg0: i32) -> (i32, i32, i32) {
    %c0_i32 = arith.constant 0 : i32
    %c0_i32_0 = arith.constant 0 : i32
    %c0_i32_1 = arith.constant 0 : i32
    %c0_i32_2 = arith.constant 0 : i32
    return %c0_i32, %c0_i32_0, %c0_i32_1 : i32, i32, i32
  }
  func.func @transform_1(%arg0: i32) -> (i32, i32, i32) {
    %c0_i32 = arith.constant 0 : i32
    %c0_i32_0 = arith.constant 0 : i32
    %c0_i32_1 = arith.constant 0 : i32
    %c0_i32_2 = arith.constant 0 : i32
    return %c0_i32, %c0_i32_0, %c0_i32_1 : i32, i32, i32
  }
  func.func @transform_2(%arg0: i32) -> (i32, i32) {
    %c0_i32 = arith.constant 0 : i32
    %c0_i32_0 = arith.constant 0 : i32
    %c0_i32_1 = arith.constant 0 : i32
    return %c0_i32, %c0_i32_0 : i32, i32
  }
  func.func @transform_3(%arg0: i32) -> (i32, i32) {
    %c0_i32 = arith.constant 0 : i32
    %c0_i32_0 = arith.constant 0 : i32
    %c0_i32_1 = arith.constant 0 : i32
    return %c0_i32, %c0_i32_0 : i32, i32
  }
  func.func @transform_4(%arg0: i32) -> (i32, i32) {
    %c0_i32 = arith.constant 0 : i32
    %c0_i32_0 = arith.constant 0 : i32
    %c0_i32_1 = arith.constant 0 : i32
    return %c0_i32, %c0_i32_0 : i32, i32
  }
  func.func @transform_5(%arg0: i32) -> (i32, i32) {
    %c0_i32 = arith.constant 0 : i32
    %c0_i32_0 = arith.constant 0 : i32
    %c0_i32_1 = arith.constant 0 : i32
    return %c0_i32, %c0_i32_0 : i32, i32
  }
  func.func @transform_6(%arg0: i32) -> (i32, i32) {
    %c0_i32 = arith.constant 0 : i32
    %c0_i32_0 = arith.constant 0 : i32
    %c0_i32_1 = arith.constant 0 : i32
    return %c0_i32, %c0_i32_0 : i32, i32
  }
  func.func @transform_7(%arg0: i32) -> (i32, i32) {
    %c0_i32 = arith.constant 0 : i32
    %c0_i32_0 = arith.constant 0 : i32
    %c0_i32_1 = arith.constant 0 : i32
    return %c0_i32, %c0_i32_0 : i32, i32
  }
  func.func @transform_8(%arg0: i32) -> (i32, i32) {
    %c0_i32 = arith.constant 0 : i32
    %c0_i32_0 = arith.constant 0 : i32
    %c0_i32_1 = arith.constant 0 : i32
    return %c0_i32, %c0_i32_0 : i32, i32
  }
  func.func @transform_9(%arg0: i32) -> (i32, i32) {
    %c0_i32 = arith.constant 0 : i32
    %c0_i32_0 = arith.constant 0 : i32
    %c0_i32_1 = arith.constant 0 : i32
    return %c0_i32, %c0_i32_0 : i32, i32
  }
  func.func @transform_10(%arg0: i32) -> (i32, i32) {
    %c0_i32 = arith.constant 0 : i32
    %c0_i32_0 = arith.constant 0 : i32
    %c0_i32_1 = arith.constant 0 : i32
    return %c0_i32, %c0_i32_0 : i32, i32
  }
  func.func @transform_11(%arg0: i32) -> (i32, i32) {
    %c0_i32 = arith.constant 0 : i32
    %c0_i32_0 = arith.constant 0 : i32
    %c0_i32_1 = arith.constant 0 : i32
    return %c0_i32, %c0_i32_0 : i32, i32
  }
  func.func @transform_12(%arg0: i32) -> (i32, i32) {
    %c0_i32 = arith.constant 0 : i32
    %c0_i32_0 = arith.constant 0 : i32
    %c0_i32_1 = arith.constant 0 : i32
    return %c0_i32, %c0_i32_0 : i32, i32
  }
  func.func @transform_13(%arg0: i32) -> (i32, i32) {
    %c0_i32 = arith.constant 0 : i32
    %c0_i32_0 = arith.constant 0 : i32
    %c0_i32_1 = arith.constant 0 : i32
    return %c0_i32, %c0_i32_0 : i32, i32
  }
  func.func @transform_14(%arg0: i32) -> (i32, i32) {
    %c0_i32 = arith.constant 0 : i32
    %c0_i32_0 = arith.constant 0 : i32
    %c0_i32_1 = arith.constant 0 : i32
    return %c0_i32, %c0_i32_0 : i32, i32
  }
  func.func @transform_15(%arg0: i32) -> (i32, i32) {
    %c0_i32 = arith.constant 0 : i32
    %c0_i32_0 = arith.constant 0 : i32
    %c0_i32_1 = arith.constant 0 : i32
    return %c0_i32, %c0_i32_0 : i32, i32
  }
  func.func @transform_16(%arg0: i32) -> (i32, i32) {
    %c0_i32 = arith.constant 0 : i32
    %c0_i32_0 = arith.constant 0 : i32
    %c0_i32_1 = arith.constant 0 : i32
    return %c0_i32, %c0_i32_0 : i32, i32
  }
}

</mosaic_0001>

<bundles_post_ra>
// kernel: tpu_custom_call.1
= control target key start
LH: loop header
LB: loop body
LE: loop exit
PB: predicated region body
PF: predicated region fallthrough
CT: control target
= control target key end

     0   :  { %s1826_s0 = inlined_call_operand.hbm [shape: f32[2,8,32], index: 0, kind: input, shape index: {}]   ;;  %s1827_s1 = inlined_call_operand.vmem [shape: f32[2,8,1], index: 1, kind: input, shape index: {}]   ;;  %s1828_s2 = inlined_call_operand.vmem [shape: f32[32,32], index: 2, kind: input, shape index: {}]   ;;  %s1829_s3 = inlined_call_operand.vmem [shape: f32[32,1], index: 3, kind: input, shape index: {}]   ;;  %s1830_s4 = inlined_call_operand.vmem [shape: f32[32,32], index: 4, kind: input, shape index: {}]   ;;  %s1831_s5 = inlined_call_operand.hbm [shape: f32[1,32], index: 5, kind: input, shape index: {}]   ;;  %s1832_s6 = inlined_call_operand.vmem [shape: f32[32,32], index: 6, kind: input, shape index: {}]   ;;  %s1833_s7 = inlined_call_operand.hbm [shape: f32[1,32], index: 7, kind: input, shape index: {}]   ;;  %s1834_s8 = inlined_call_operand.hbm [shape: f32[32,32], index: 8, kind: input, shape index: {}]   ;;  %s1835_s9 = inlined_call_operand.hbm [shape: f32[1,32], index: 9, kind: input, shape index: {}]   ;;  %s1836_s10 = inlined_call_operand.vmem [shape: f32[32,8], index: 10, kind: input, shape index: {}]   ;;  %s1837_s11 = inlined_call_operand.hbm [shape: f32[8,32], index: 11, kind: input, shape index: {}]   ;;  %s1838_s12 = inlined_call_operand.vmem [shape: f32[32,32], index: 12, kind: input, shape index: {}]   ;;  %s1839_s13 = inlined_call_operand.vmem [shape: f32[1,32], index: 13, kind: input, shape index: {}]   ;;  %s1840_s14 = inlined_call_operand.hbm [shape: f32[32,128], index: 14, kind: input, shape index: {}]   ;;  %s1841_s15 = inlined_call_operand.vmem [shape: f32[1,128], index: 15, kind: input, shape index: {}]   ;;  %s1842_s16 = inlined_call_operand.hbm [shape: f32[4,128], index: 16, kind: output, shape index: {}]  }
   0x1   :  { %1844 = sst [smem:[#allocation20_spill]] %s1826_s0 }
   0x2   :  { %21 = vsyncpa [#allocation3], 0 }
   0x3   :  { %22 = vsyncpa [#allocation6], 0 }
   0x4   :  { %23 = vsyncpa [#allocation9], 0 }
   0x5   :  { %24 = vsyncpa [#allocation12], 0 }
   0x6   :  { %25 = vsyncpa [#allocation4], 0  ;;  %s1478_s21 = smov [#allocation5]   ;;  %s1292_s25 = scalar_lea.hbm %s1831_s5, 16 }
   0x7   :  { %s52_s22 = sshll.u32 %s1478_s21, 4  ;;  %p1293_p0 = scmp.ne.s32.totalorder %s1831_s5, %s1292_s25  ;;  %s53_s22 = int_to_ptr.vmem [resolvable:$true] %s52_s22 }
   0x8   :  { %p1296_p1 = scmp.lt.u32.totalorder %s1292_s25, %s1831_s5 }
   0xa   :  { %p1298_p2 = pnand %p1296_p1, %p1293_p0 }
   0xc   :  { %1301 = shalt.err (!%p1298_p2)
}
   0xd   :  { %s1302_s30 = scalar_lea.vmem %s53_s22, 16  ;;  %s1306_s0 = scalar_lea.vmem %s53_s22, 32 }
   0xe   :  { %p1303_p3 = scmp.ne.s32.totalorder %s53_s22, %s1302_s30  ;;  %p1307_p4 = scmp.lt.s32.totalorder %s53_s22, %s53_s22 }
   0xf   :  { %p1308_p5 = scmp.lt.s32.totalorder %s1306_s0, %s1302_s30 }
  0x11   :  { %p1309_p6 = por %p1308_p5, %p1307_p4 }
  0x13   :  { %p1310_p7 = pnand %p1309_p6, %p1303_p3 }
  0x15   :  { %1313 = shalt.err (!%p1310_p7)
}
  0x16   :  { %55 = dma.hbm_to_vmem [thread:$0]  %s1831_s5, 16, %s53_s22, [#allocation6]  }
  0x17   :  { %s1479_s19 = smov [#allocation8]   ;;  %s1480_s21 = smov [#allocation11]  }
  0x18   :  { %s73_s20 = sshll.u32 %s1479_s19, 4  ;;  %s98_s23 = sshll.u32 %s1480_s21, 4  ;;  %s74_s20 = int_to_ptr.vmem [resolvable:$true] %s73_s20  ;;  %s99_s23 = int_to_ptr.vmem [resolvable:$true] %s98_s23 }
  0x19   :  { %s1314_s26 = scalar_lea.hbm %s1834_s8, 512 }
  0x1a   :  { %p1315_p8 = scmp.ne.s32.totalorder %s1834_s8, %s1314_s26  ;;  %p1318_p9 = scmp.lt.u32.totalorder %s1314_s26, %s1834_s8 }
  0x1c   :  { %p1320_p10 = pnand %p1318_p9, %p1315_p8 }
  0x1e   :  { %1323 = shalt.err (!%p1320_p10)
}
  0x1f   :  { %s1324_s5 = scalar_lea.vmem %s74_s20, 512  ;;  %p1329_p12 = scmp.lt.s32.totalorder %s74_s20, %s74_s20 }
  0x20   :  { %p1325_p11 = scmp.ne.s32.totalorder %s74_s20, %s1324_s5  ;;  %p1330_p13 = scmp.lt.s32.totalorder %s1324_s5, %s1324_s5 }
  0x22   :  { %p1331_p0 = por %p1330_p13, %p1329_p12 }
  0x24   :  { %p1332_p1 = pnand %p1331_p0, %p1325_p11 }
  0x26   :  { %1335 = shalt.err (!%p1332_p1)
}
  0x27   :  { %s1481_s22 = smov 128   ;;  %s1482_s0 = smov 8  }
  0x28   :  { %79 = dma.hbm_to_vmem [thread:$0]  %s1834_s8, 512, %s74_s20, [#allocation9], %s1481_s22, %s1481_s22, %s1482_s0  }
  0x29   :  { %s1336_s24 = scalar_lea.hbm %s1837_s11, 128 }
  0x2a   :  { %p1337_p2 = scmp.ne.s32.totalorder %s1837_s11, %s1336_s24  ;;  %p1340_p3 = scmp.lt.u32.totalorder %s1336_s24, %s1837_s11 }
  0x2c   :  { %p1342_p4 = pnand %p1340_p3, %p1337_p2 }
  0x2e   :  { %1345 = shalt.err (!%p1342_p4)
}
  0x2f   :  { %s1346_s29 = scalar_lea.vmem %s99_s23, 128  ;;  %p1351_p6 = scmp.lt.s32.totalorder %s99_s23, %s99_s23 }
  0x30   :  { %p1347_p5 = scmp.ne.s32.totalorder %s99_s23, %s1346_s29  ;;  %p1352_p7 = scmp.lt.s32.totalorder %s1346_s29, %s1346_s29 }
  0x32   :  { %p1353_p8 = por %p1352_p7, %p1351_p6 }
  0x34   :  { %p1354_p9 = pnand %p1353_p8, %p1347_p5 }
  0x36   :  { %1357 = shalt.err (!%p1354_p9)
}
  0x37   :  { %101 = dma.hbm_to_vmem [thread:$0]  %s1837_s11, 128, %s99_s23, [#allocation12]  }
  0x38   :  { %s1483_s30 = smov [#allocation2]   ;;  %s1484_s17 = smov [#allocation7]  }
  0x39   :  { %s31_s5 = sshll.u32 %s1483_s30, 4  ;;  %s64_s18 = sshll.u32 %s1484_s17, 4  ;;  %s32_s5 = int_to_ptr.vmem [resolvable:$true] %s31_s5  ;;  %s65_s18 = int_to_ptr.vmem [resolvable:$true] %s64_s18 }
  0x3a   :  { %s1845_s24 = sld [smem:[#allocation20_spill]] }
  0x40   :  { %s1358_s25 = scalar_lea.hbm %s1845_s24, 256 }
  0x41   :  { %p1359_p10 = scmp.ne.s32.totalorder %s1845_s24, %s1358_s25  ;;  %p1362_p11 = scmp.lt.u32.totalorder %s1358_s25, %s1845_s24 }
  0x43   :  { %p1364_p12 = pnand %p1362_p11, %p1359_p10 }
  0x45   :  { %1367 = shalt.err (!%p1364_p12)
}
  0x46   :  { %s1368_s11 = scalar_lea.vmem %s32_s5, 256  ;;  %p1373_p0 = scmp.lt.s32.totalorder %s32_s5, %s32_s5 }
  0x47   :  { %p1369_p13 = scmp.ne.s32.totalorder %s32_s5, %s1368_s11  ;;  %p1374_p1 = scmp.lt.s32.totalorder %s1368_s11, %s1368_s11 }
  0x49   :  { %p1375_p2 = por %p1374_p1, %p1373_p0 }
  0x4b   :  { %p1376_p3 = pnand %p1375_p2, %p1369_p13 }
  0x4d   :  { %1379 = shalt.err (!%p1376_p3)
}
  0x4e   :  { %37 = dma.hbm_to_vmem [thread:$0]  %s1845_s24, 256, %s32_s5, [#allocation3], %s1481_s22, %s1481_s22, %s1482_s0  }
  0x4f   :  { %s1380_s17 = scalar_lea.hbm %s1833_s7, 16 }
  0x50   :  { %p1381_p4 = scmp.ne.s32.totalorder %s1833_s7, %s1380_s17  ;;  %p1384_p5 = scmp.lt.u32.totalorder %s1380_s17, %s1833_s7 }
  0x52   :  { %p1386_p6 = pnand %p1384_p5, %p1381_p4 }
  0x54   :  { %1389 = shalt.err (!%p1386_p6)
}
  0x55   :  { %s1390_s27 = scalar_lea.vmem %s65_s18, 16  ;;  %s1394_s28 = scalar_lea.vmem %s65_s18, 32 }
  0x56   :  { %p1391_p7 = scmp.ne.s32.totalorder %s65_s18, %s1390_s27  ;;  %p1395_p8 = scmp.lt.s32.totalorder %s65_s18, %s65_s18 }
  0x57   :  { %p1396_p9 = scmp.lt.s32.totalorder %s1394_s28, %s1390_s27 }
  0x59   :  { %p1397_p10 = por %p1396_p9, %p1395_p8 }
  0x5b   :  { %p1398_p11 = pnand %p1397_p10, %p1391_p7 }
  0x5d   :  { %1401 = shalt.err (!%p1398_p11)
}
  0x5e   :  { %67 = dma.hbm_to_vmem [thread:$0]  %s1833_s7, 16, %s65_s18, [#allocation6]  }
  0x5f   :  { %s1485_s29 = smov [#allocation10]   ;;  %s1486_s23 = smov [#allocation13]  }
  0x60   :  { %s86_s11 = sshll.u32 %s1485_s29, 4  ;;  %s111_s8 = sshll.u32 %s1486_s23, 4  ;;  %s87_s11 = int_to_ptr.vmem [resolvable:$true] %s86_s11  ;;  %s112_s8 = int_to_ptr.vmem [resolvable:$true] %s111_s8 }
  0x61   :  { %s1402_s17 = scalar_lea.hbm %s1835_s9, 16 }
  0x62   :  { %p1403_p12 = scmp.ne.s32.totalorder %s1835_s9, %s1402_s17  ;;  %p1406_p13 = scmp.lt.u32.totalorder %s1402_s17, %s1835_s9 }
  0x64   :  { %p1408_p0 = pnand %p1406_p13, %p1403_p12 }
  0x66   :  { %1411 = shalt.err (!%p1408_p0)
}
  0x67   :  { %s1412_s7 = scalar_lea.vmem %s87_s11, 16  ;;  %s1416_s18 = scalar_lea.vmem %s87_s11, 32 }
  0x68   :  { %p1413_p1 = scmp.ne.s32.totalorder %s87_s11, %s1412_s7  ;;  %p1417_p2 = scmp.lt.s32.totalorder %s87_s11, %s87_s11 }
  0x69   :  { %p1418_p3 = scmp.lt.s32.totalorder %s1416_s18, %s1412_s7 }
  0x6b   :  { %p1419_p4 = por %p1418_p3, %p1417_p2 }
  0x6d   :  { %p1420_p5 = pnand %p1419_p4, %p1413_p1 }
  0x6f   :  { %1423 = shalt.err (!%p1420_p5)
}
  0x70   :  { %89 = dma.hbm_to_vmem [thread:$0]  %s1835_s9, 16, %s87_s11, [#allocation9]  }
  0x71   :  { %s1424_s29 = scalar_lea.hbm %s1840_s14, 512 }
  0x72   :  { %p1425_p6 = scmp.ne.s32.totalorder %s1840_s14, %s1424_s29  ;;  %p1428_p7 = scmp.lt.u32.totalorder %s1424_s29, %s1840_s14 }
  0x74   :  { %p1430_p8 = pnand %p1428_p7, %p1425_p6 }
  0x76   :  { %1433 = shalt.err (!%p1430_p8)
}
  0x77   :  { %s1434_s19 = scalar_lea.vmem %s112_s8, 512  ;;  %p1439_p10 = scmp.lt.s32.totalorder %s112_s8, %s112_s8 }
  0x78   :  { %p1435_p9 = scmp.ne.s32.totalorder %s112_s8, %s1434_s19  ;;  %p1440_p11 = scmp.lt.s32.totalorder %s1434_s19, %s1434_s19 }
  0x7a   :  { %p1441_p12 = por %p1440_p11, %p1439_p10 }
  0x7c   :  { %p1442_p13 = pnand %p1441_p12, %p1435_p9 }
  0x7e   :  { %1445 = shalt.err (!%p1442_p13)
}
  0x7f   :  { %117 = dma.hbm_to_vmem [thread:$0]  %s1840_s14, 512, %s112_s8, [#allocation12], %s1481_s22, %s1481_s22, %s1482_s0  }
  0x80   :  { %1468 = dma.done.wait [#allocation3], 256  }
  0x81   :  { %1469 = vsyncadd [#allocation3], 4294967040 }
  0x82   :  { %1470 = dma.done.wait [#allocation6], 32  }
  0x83   :  { %1471 = vsyncadd [#allocation6], 4294967264 }
  0x84   :  { %1472 = dma.done.wait [#allocation9], 528  }
  0x85   :  { %1473 = vsyncadd [#allocation9], 4294966768 }
  0x86   :  { %1474 = dma.done.wait [#allocation12], 640  }
  0x87   :  { %1475 = vsyncadd [#allocation12], 4294966656  ;;  %v1487_v0 = vmov 0   ;;  %vm180_vm0 = vcmask 7168   ;;  %v143_v1 = vld [vmem:[%s1827_s1] sm:$0xff]  ;;  %v144_v2 = vld [vmem:[%s1827_s1 + $0x8] sm:$0xff] }
  0x88   :  { %1270 = vset.pattern.permute.xlu0 %v1487_v0  ;;  %1271 = vset.pattern.permute.xlu1 %v1487_v0  ;;  %v181_v3 = vsel %vm180_vm0, %v143_v1, 0.0  ;;  %v188_v4 = vsel %vm180_vm0, %v144_v2, 0.0  ;;  %v149_v11 = vld [vmem:[%s1829_s3] sm:$0xff]  ;;  %v151_v14 = vld [vmem:[%s1829_s3 + $0x10] sm:$0xff]  ;;  %v150_v21 = vld [vmem:[%s1829_s3 + $0x8] sm:$0xff]  ;;  %v1488_v24 = vmov 0.0|0.0  }
  0x89   :  { %155 = vperm.xlu0 %1270, %v143_v1   ;;  %v182_v5 = vrot.slane %v181_v3, 4  ;;  %v189_v6 = vrot.slane %v188_v4, 4  ;;  %v211_v22 = vld [vmem:[%s1830_s4] sm:$0xff]  ;;  %v212_v23 = vld [vmem:[%s1830_s4 + $0x8] sm:$0xff]  ;;  %1213 = vmatprep.subr.bf16.mxu0 %v1488_v24  ;;  %v152_v26 = vld [vmem:[%s1829_s3 + $0x18] sm:$0xff]  ;;  %vm1489_vm1 = vmmov 0  }
  0x8a   :  { %v1214_v25 = vpack.c.bf16 %v212_v23, %v211_v22  ;;  %v298_v27 = vld [vmem:[%s1832_s6] sm:$0xff]  ;;  %v299_v28 = vld [vmem:[%s1832_s6 + $0x8] sm:$0xff]  ;;  %v213_v30 = vld [vmem:[%s1830_s4 + $0x10] sm:$0xff]  ;;  %v1490_v34 = vmov 0.0   ;;  %vm165_vm2 = vcmask 261120   ;;  %vm224_vm3 = vcmask 1041409  }
  0x8b   :  { %v183_v7 = vadd.f32 %v182_v5, %v181_v3  ;;  %v190_v8 = vadd.f32 %v189_v6, %v188_v4  ;;  %v1219_v29 = vpack.c.bf16 %v299_v28, %v298_v27  ;;  %v214_v31 = vld [vmem:[%s1830_s4 + $0x18] sm:$0xff]  ;;  %v300_v32 = vld [vmem:[%s1832_s6 + $0x10] sm:$0xff]  ;;  %1138 = vmatprep.mubr.msk.f32.mxu0 %vm1489_vm1, %v1490_v34  ;;  %v145_v37 = vld [vmem:[%s1828_s2] sm:$0xff]  ;;  %vm660_vm4 = vcmask 64512   ;;  %s1492_s4 = smov [#allocation14]  }
  0x8c   :  { %1215 = vmatpush3.bf16.msra.mxu0 %v1214_v25  ;;  %v1217_v33 = vpack.c.bf16 %v214_v31, %v213_v30  ;;  %v301_v35 = vld [vmem:[%s1832_s6 + $0x18] sm:$0xff]  ;;  %v1723_v38 = vld [vmem:[%s1828_s2 + $0x8] sm:$0xff]  ;;  %1149 = vmatprep.mubr.msk.f32.mxu1 %vm165_vm2, %v145_v37  ;;  %v1729_v39 = vld [vmem:[%s1828_s2 + $0x10] sm:$0xff]  ;;  %vm883_vm5 = vcmask 1042434   ;;  %vm885_vm6 = vcmask 1043459   ;;  %s1050_s22 = sshll.u32 %s1492_s4, 4  ;;  %s1051_s22 = int_to_ptr.vmem [resolvable:$true] %s1050_s22 }
  0x8d   :  { %160 = vperm.xlu0 %1270, %v144_v2   ;;  %v184_v9 = vrot.slane %v183_v7, 2  ;;  %v191_v10 = vrot.slane %v190_v8, 2  ;;  %1216 = vmatprep.subr.bf16.mxu0 %v1488_v24  ;;  %v1223_v36 = vpack.c.bf16 %v301_v35, %v300_v32  ;;  %v1738_v40 = vld [vmem:[%s1828_s2 + $0x18] sm:$0xff]  ;;  %v141_v41 = vld [vmem:[#allocation2] sm:$0xff]  ;;  %v142_v44 = vld [vmem:[#allocation2 + $0x8] sm:$0xff]  ;;  %s1446_s0 = scalar_lea.vmem %s1051_s22, 64  ;;  %p1451_p1 = scmp.lt.s32.totalorder %s1051_s22, %s1051_s22 }
  0x8e   :  { %1220 = vmatprep.subr.bf16.mxu1 %v1219_v29  ;;  %v539_v4 = vld [vmem:[%s1836_s10] sm:$0xff]  ;;  %v540_v5 = vld [vmem:[%s1836_s10 + $0x8] sm:$0xff]  ;;  %v1064_v25 = vld [vmem:[#allocation7] ss:$0 sm:$0xff]  ;;  %p1447_p0 = scmp.ne.s32.totalorder %s1051_s22, %s1446_s0  ;;  %p1452_p2 = scmp.lt.s32.totalorder %s1446_s0, %s1446_s0 }
  0x8f   :  { %v192_v12 = vadd.f32 %v191_v10, %v190_v8  ;;  %v185_v13 = vadd.f32 %v184_v9, %v183_v7  ;;  %1222 = vmatpush3.bf16.msra.mxu1 %v1219_v29  ;;  %v1235_v6 = vpack.c.bf16 %v540_v5, %v539_v4  ;;  %v541_v9 = vld [vmem:[%s1836_s10 + $0x10] sm:$0xff]  ;;  %v542_v10 = vld [vmem:[%s1836_s10 + $0x18] sm:$0xff] }
  0x90   :  { %1218 = vmatpush3.bf16.msra.mxu0 %v1217_v33  ;;  %1224 = vmatprep.subr.bf16.mxu1 %v1223_v36  ;;  %p1453_p3 = por %p1452_p2, %p1451_p1 }
  0x91   :  { %545 = vperm.xlu0 %1270, %v149_v11   ;;  %v186_v15 = vrot.slane %v185_v13, 1  ;;  %v193_v16 = vrot.slane %v192_v12, 1  ;;  %v1239_v11 = vpack.c.bf16 %v542_v10, %v541_v9 }
  0x92   :  { %p1454_p4 = pnand %p1453_p3, %p1447_p0 }
  0x93   :  { %v187_v17 = vadd.f32 %v186_v15, %v185_v13  ;;  %v194_v18 = vadd.f32 %v193_v16, %v192_v12  ;;  %1226 = vmatpush3.bf16.msra.mxu1 %v1223_v36  ;;  %v506_v16 = vlaneseq }
  0x94   :  { %1236 = vmatprep.subr.bf16.mxu1 %v1235_v6 }
  0x95   :  { %555 = vperm.xlu0 %1270, %v151_v14   ;;  %v195_v19 = vmax.f32 %v187_v17, 1e-09  ;;  %v196_v20 = vmax.f32 %v194_v18, 1e-09  ;;  %v1491_v14 = vmov 1966171168  }
  0x96   :  { %1150 = vmatmul.mubr.msk.f32.vlgmr.msra.gmra.mrb[0].mxu1 %vm165_vm2, %v1723_v38  ;;  %v504_v15 = vunpack.c.l.s4 %v1491_v14  ;;  %v507_v18 = vshrl.u32 %v506_v16, 7 }
  0x97   :  { %199 = vperm.xlu1 %1271, %v195_v19   ;;  %1152 = vmatprep.mubr.msk.f32.mxu1 %vm165_vm2, %v1729_v39  ;;  %v1062_v19 = vld [vmem:[#allocation5] ss:$0 sm:$0xff] }
  0x98   :  { %1238 = vmatpush3.bf16.msra.mxu1 %v1235_v6  ;;  %v505_v17 = vunpack.c.0.s8 %v504_v15  ;;  %v527_v27 = vsub.s32 0, %v507_v18 }
  0x99   :  { %1240 = vmatprep.subr.bf16.mxu1 %v1239_v11 }
  0x9a   :  { %1153 = vmatmul.mubr.msk.f32.gmra.mrb[2].mxu1 %vm165_vm2, %v1738_v40 }
  0x9b   :  { %204 = vperm.xlu1 %1271, %v196_v20   ;;  %v508_v20 = vsub.s32 %v505_v17, %v507_v18 }
  0x9c   :  { %1242 = vmatpush3.bf16.msra.mxu1 %v1239_v11 }
  0x9d   :  { %1243 = vmatprep.subr.bf16.mxu1 %v1488_v24 }
  0x9f   :  { %550 = vperm.xlu1 %1271, %v150_v21  }
  0xa3   :  { %560 = vperm.xlu1 %1271, %v152_v26  }
 0x108   :  { %v156_v42 = vpop.permute.xlu0 %155 }
 0x109   :  { %v163_v43 = vmul.f32 %v156_v42, %v141_v41 }
 0x10b   :  { %v166_v47 = vsel %vm165_vm2, %v163_v43, 0.0 }
 0x10c   :  { %v161_v45 = vpop.permute.xlu0 %160  ;;  %v167_v49 = vrot.slane %v166_v47, 4 }
 0x10d   :  { %v164_v46 = vmul.f32 %v161_v45, %v142_v44  ;;  %v406_v45 = vld [vmem:[#allocation8] sm:$0xff] }
 0x10e   :  { %v168_v51 = vadd.f32 %v167_v49, %v166_v47  ;;  %v409_v49 = vld [vmem:[#allocation8 + $0x18] sm:$0xff] }
 0x10f   :  { %v173_v48 = vsel %vm165_vm2, %v164_v46, 0.0  ;;  %v407_v46 = vld [vmem:[#allocation8 + $0x8] sm:$0xff] }
 0x110   :  { %v174_v50 = vrot.slane %v173_v48, 4  ;;  %v169_v54 = vrot.slane %v168_v51, 2  ;;  %v1227_v47 = vpack.c.bf16 %v407_v46, %v406_v45 }
 0x112   :  { %v175_v52 = vadd.f32 %v174_v50, %v173_v48  ;;  %v170_v57 = vadd.f32 %v169_v54, %v168_v51  ;;  %1228 = vmatprep.subr.bf16.mxu0 %v1227_v47  ;;  %v408_v48 = vld [vmem:[#allocation8 + $0x10] sm:$0xff]  ;;  %v737_v51 = vld [vmem:[#allocation11] sm:$0xff] }
 0x113   :  { %v1231_v50 = vpack.c.bf16 %v409_v49, %v408_v48 }
 0x114   :  { %v176_v55 = vrot.slane %v175_v52, 2  ;;  %v171_v59 = vrot.slane %v170_v57, 1 }
 0x116   :  { %v200_v53 = vpop.permute.xlu1 %199  ;;  %v177_v58 = vadd.f32 %v176_v55, %v175_v52  ;;  %v172_v62 = vadd.f32 %v171_v59, %v170_v57 }
 0x117   :  { %1272 = vrcp.f32 %v200_v53  ;;  %v546_v53 = vpop.permute.xlu0 %545 }
 0x118   :  { %v178_v60 = vrot.slane %v177_v58, 1 }
 0x11a   :  { %v205_v56 = vpop.permute.xlu1 %204  ;;  %v179_v63 = vadd.f32 %v178_v60, %v177_v58 }
 0x11b   :  { %1274 = vrcp.f32 %v205_v56 }
 0x11e   :  { %v551_v52 = vpop.permute.xlu1 %550 }
 0x121   :  { %v1273_v61 = vpop.eup %1272 }
 0x122   :  { %v208_v1 = vmul.f32 %v1273_v61, %v172_v62  ;;  %v561_v58 = vpop.permute.xlu1 %560 }
 0x125   :  { %v1275_v0 = vpop.eup %1274 }
 0x126   :  { %v210_v2 = vmul.f32 %v1275_v0, %v179_v63 }
 0x128   :  { %v225_v3 = vsel %vm224_vm3, %v210_v2, %v208_v1 }
 0x129   :  { %1139 = vmatmul.mubr.msk.f32.vlgmr.msra.gmra.mrb[0].mxu0 %vm165_vm2, %v225_v3 }
 0x12a   :  { %1163 = vmatprep.mubr.msk.f32.mxu0 %vm165_vm2, %v145_v37  ;;  %1230 = vmatpush3.bf16.msra.mxu0 %v1227_v47 }
 0x12b   :  { %1232 = vmatprep.subr.bf16.mxu0 %v1231_v50 }
 0x12e   :  { %1234 = vmatpush3.bf16.msra.mxu0 %v1231_v50 }
 0x12f   :  { %1183 = vmatprep.subr.mxu0 %v737_v51 }
 0x131   :  { %1164 = vmatmul.mubr.msk.f32.vlgmr.msra.gmra.mrb[2].mxu0 %vm165_vm2, %v1723_v38 }
 0x132   :  { %1166 = vmatprep.mubr.msk.f32.mxu0 %vm165_vm2, %v1729_v39  ;;  %1184 = vmatpush3.msra.mxu0 %v737_v51 }
 0x133   :  { %1249 = vmatprep.subr.bf16.mxu0 %v1488_v24 }
 0x135   :  { %1167 = vmatmul.mubr.msk.f32.gmra.mrb[4].mxu0 %vm165_vm2, %v1738_v40  ;;  %v556_v40 = vpop.permute.xlu0 %555 }
 0x169   :  { %v1151_v7 = vpop.f32.mrb[0].mxu1 }
 0x16a   :  { %v387_v8 = vpop.f32.mrb[1].mxu1  ;;  %v393_v30 = vadd.f32 %v1151_v7, %v1064_v25 }
 0x16b   :  { %v388_v31 = vadd.f32 %v1064_v25, %v387_v8 }
 0x16d   :  { %v1154_v12 = vpop.f32.mrb[2].mxu1 }
 0x16e   :  { %v397_v13 = vpop.f32.mrb[3].mxu1  ;;  %v403_v33 = vadd.f32 %v1154_v12, %v1064_v25 }
 0x16f   :  { %v398_v36 = vadd.f32 %v1064_v25, %v397_v13 }
 0x1fc   :  { %v294_v21 = vpop.f32.mrb[0].mxu0 }
 0x1fd   :  { %v295_v22 = vadd.f32 %v1062_v19, %v294_v21  ;;  %v1140_v23 = vpop.f32.mrb[1].mxu0 }
 0x1ff   :  { %v509_v26 = vrot.slane %v295_v22, %v508_v20 }
 0x201   :  { %v510_v28 = vcombine.high %v509_v26, %v509_v26  ;;  %v517_v29 = vrot.slane %v509_v26, %v508_v20 }
 0x203   :  { %v528_v32 = vrot.slane %v517_v29, %v527_v27  ;;  %v524_v35 = vrot.slane %v510_v28, %v508_v20 }
 0x205   :  { %v536_v37 = vmul.f32 %v528_v32, %v393_v30  ;;  %v535_v41 = vmul.f32 %v528_v32, %v388_v31  ;;  %v532_v42 = vrot.slane %v524_v35, %v527_v27 }
 0x207   :  { %v538_v43 = vmul.f32 %v532_v42, %v403_v33  ;;  %v537_v44 = vmul.f32 %v532_v42, %v398_v36  ;;  %1177 = vmatprep.mubr.msk.f32.mxu1 %vm165_vm2, %v535_v41 }
 0x208   :  { %1178 = vmatmul.mubr.msk.f32.vlgmr.msra.gmra.mrb[4].mxu1 %vm165_vm2, %v536_v37 }
 0x209   :  { %1180 = vmatprep.mubr.msk.f32.mxu1 %vm165_vm2, %v537_v44 }
 0x20c   :  { %1181 = vmatmul.mubr.msk.f32.gmra.mrb[6].mxu1 %vm165_vm2, %v538_v43 }
 0x20d   :  { %1199 = vmatprep.mubr.msk.f32.mxu1 %vm1489_vm1, %v1490_v34 }
 0x2db   :  { %v1179_v54 = vpop.f32.mrb[4].mxu1 }
 0x2dc   :  { %v647_v55 = vadd.f32 %v1179_v54, %v551_v52  ;;  %v641_v56 = vpop.f32.mrb[5].mxu1 }
 0x2dd   :  { %v642_v57 = vadd.f32 %v641_v56, %v546_v53 }
 0x2de   :  { %v668_v38 = vsel %vm660_vm4, %v647_v55, -inf }
 0x2df   :  { %v669_v59 = vrot.slane %v668_v38, 4  ;;  %v661_v39 = vsel %vm660_vm4, %v642_v57, -inf  ;;  %v1182_v60 = vpop.f32.mrb[6].mxu1 }
 0x2e0   :  { %v662_v61 = vrot.slane %v661_v39, 4  ;;  %v657_v62 = vadd.f32 %v1182_v60, %v561_v58  ;;  %v651_v63 = vpop.f32.mrb[7].mxu1 }
 0x2e1   :  { %v670_v0 = vmax.f32 %v668_v38, %v669_v59  ;;  %v652_v1 = vadd.f32 %v651_v63, %v556_v40 }
 0x2e2   :  { %v663_v2 = vmax.f32 %v661_v39, %v662_v61  ;;  %v682_v3 = vsel %vm660_vm4, %v657_v62, -inf }
 0x2e3   :  { %v671_v4 = vrot.slane %v670_v0, 2  ;;  %v683_v5 = vrot.slane %v682_v3, 4  ;;  %v675_v6 = vsel %vm660_vm4, %v652_v1, -inf }
 0x2e4   :  { %v664_v7 = vrot.slane %v663_v2, 2  ;;  %v676_v8 = vrot.slane %v675_v6, 4 }
 0x2e5   :  { %v672_v9 = vmax.f32 %v670_v0, %v671_v4  ;;  %v684_v10 = vmax.f32 %v682_v3, %v683_v5 }
 0x2e6   :  { %v665_v11 = vmax.f32 %v663_v2, %v664_v7  ;;  %v677_v12 = vmax.f32 %v675_v6, %v676_v8 }
 0x2e7   :  { %v673_v13 = vrot.slane %v672_v9, 1  ;;  %v685_v14 = vrot.slane %v684_v10, 2 }
 0x2e8   :  { %v666_v15 = vrot.slane %v665_v11, 1  ;;  %v678_v16 = vrot.slane %v677_v12, 2 }
 0x2e9   :  { %v674_v17 = vmax.f32 %v672_v9, %v673_v13  ;;  %v686_v18 = vmax.f32 %v684_v10, %v685_v14 }
 0x2ea   :  { %v667_v19 = vmax.f32 %v665_v11, %v666_v15  ;;  %v679_v20 = vmax.f32 %v677_v12, %v678_v16  ;;  %v1165_v11 = vpop.f32.mrb[2].mxu0  ;;  %v867_v15 = vld [vmem:[%s1838_s12] sm:$0xff]  ;;  %v868_v16 = vld [vmem:[%s1838_s12 + $0x8] sm:$0xff] }
 0x2eb   :  { %v690_v21 = vsub.f32 %v647_v55, %v674_v17  ;;  %v687_v22 = vrot.slane %v686_v18, 1  ;;  %v483_v12 = vpop.f32.mrb[3].mxu0  ;;  %v1244_v17 = vpack.c.bf16 %v868_v16, %v867_v15 }
 0x2ec   :  { %v689_v23 = vsub.f32 %v642_v57, %v667_v19  ;;  %v680_v25 = vrot.slane %v679_v20, 1  ;;  %v1168_v13 = vpop.f32.mrb[4].mxu0 }
 0x2ed   :  { %v695_v26 = vmul.f32 1.442695, %v690_v21  ;;  %v688_v27 = vmax.f32 %v686_v18, %v687_v22  ;;  %v493_v14 = vpop.f32.mrb[5].mxu0  ;;  %1245 = vmatpush3.bf16.msra.mxu1 %v1244_v17  ;;  %v870_v18 = vld [vmem:[%s1838_s12 + $0x18] sm:$0xff]  ;;  %v960_v21 = vld [vmem:[#allocation13 + $0x8] sm:$0xff]  ;;  %v961_v22 = vld [vmem:[#allocation13 + $0x10] sm:$0xff] }
 0x2ee   :  { %v693_v28 = vmul.f32 1.442695, %v689_v23  ;;  %v681_v29 = vmax.f32 %v679_v20, %v680_v25  ;;  %1246 = vmatprep.subr.bf16.mxu1 %v1488_v24  ;;  %v959_v20 = vld [vmem:[#allocation13] sm:$0xff]  ;;  %v962_v25 = vld [vmem:[#allocation13 + $0x18] sm:$0xff] }
 0x2ef   :  { %1276 = vpow2.f32 %v695_v26  ;;  %v692_v30 = vsub.f32 %v657_v62, %v688_v27  ;;  %v1250_v23 = vpack.c.bf16 %v960_v21, %v959_v20  ;;  %v1253_v26 = vpack.c.bf16 %v962_v25, %v961_v22  ;;  %v1069_v27 = vld [vmem:[#allocation10] ss:$0 sm:$0xff] }
 0x2f0   :  { %1278 = vpow2.f32 %v693_v28  ;;  %v691_v31 = vsub.f32 %v652_v1, %v681_v29  ;;  %v489_v28 = vadd.f32 %v1165_v11, %v1069_v27  ;;  %v484_v29 = vadd.f32 %v1069_v27, %v483_v12  ;;  %v1084_v11 = vld [vmem:[%s1841_s15] ss:$0 sm:$0xff] }
 0x2f1   :  { %v699_v32 = vmul.f32 1.442695, %v692_v30 }
 0x2f2   :  { %v697_v33 = vmul.f32 1.442695, %v691_v31 }
 0x2f3   :  { %1280 = vpow2.f32 %v699_v32 }
 0x2f4   :  { %1282 = vpow2.f32 %v697_v33 }
 0x2f9   :  { %v1277_v35 = vpop.eup %1276 }
 0x2fa   :  { %v1279_v36 = vpop.eup %1278  ;;  %v708_v37 = vsel %vm660_vm4, %v1277_v35, 0.0 }
 0x2fb   :  { %v709_v41 = vrot.slane %v708_v37, 4  ;;  %v701_v42 = vsel %vm660_vm4, %v1279_v36, 0.0 }
 0x2fc   :  { %v702_v43 = vrot.slane %v701_v42, 4 }
 0x2fd   :  { %v1281_v44 = vpop.eup %1280  ;;  %v710_v45 = vadd.f32 %v709_v41, %v708_v37  ;;  %v494_v37 = vadd.f32 %v1069_v27, %v493_v14 }
 0x2fe   :  { %v1283_v46 = vpop.eup %1282  ;;  %v703_v47 = vadd.f32 %v702_v43, %v701_v42  ;;  %v722_v48 = vsel %vm660_vm4, %v1281_v44, 0.0 }
 0x2ff   :  { %v711_v49 = vrot.slane %v710_v45, 2  ;;  %v723_v50 = vrot.slane %v722_v48, 4  ;;  %v715_v51 = vsel %vm660_vm4, %v1283_v46, 0.0 }
 0x300   :  { %v704_v52 = vrot.slane %v703_v47, 2  ;;  %v716_v53 = vrot.slane %v715_v51, 4 }
 0x301   :  { %v712_v54 = vadd.f32 %v711_v49, %v710_v45  ;;  %v724_v55 = vadd.f32 %v723_v50, %v722_v48 }
 0x302   :  { %v705_v56 = vadd.f32 %v704_v52, %v703_v47  ;;  %v717_v57 = vadd.f32 %v716_v53, %v715_v51 }
 0x303   :  { %v713_v38 = vrot.slane %v712_v54, 1  ;;  %v725_v58 = vrot.slane %v724_v55, 2 }
 0x304   :  { %v706_v59 = vrot.slane %v705_v56, 1  ;;  %v718_v39 = vrot.slane %v717_v57, 2 }
 0x305   :  { %v714_v60 = vadd.f32 %v713_v38, %v712_v54  ;;  %v726_v40 = vadd.f32 %v725_v58, %v724_v55 }
 0x306   :  { %v719_v61 = vadd.f32 %v718_v39, %v717_v57  ;;  %v707_v62 = vadd.f32 %v706_v59, %v705_v56 }
 0x307   :  { %1284 = vrcp.f32 %v714_v60  ;;  %v727_v63 = vrot.slane %v726_v40, 1 }
 0x308   :  { %v720_v0 = vrot.slane %v719_v61, 1  ;;  %1286 = vrcp.f32 %v707_v62 }
 0x309   :  { %v728_v1 = vadd.f32 %v727_v63, %v726_v40 }
 0x30a   :  { %v721_v2 = vadd.f32 %v720_v0, %v719_v61 }
 0x30b   :  { %1288 = vrcp.f32 %v728_v1 }
 0x30c   :  { %1290 = vrcp.f32 %v721_v2 }
 0x311   :  { %v1285_v3 = vpop.eup %1284 }
 0x312   :  { %v1287_v4 = vpop.eup %1286  ;;  %v732_v6 = vmul.f32 %v1285_v3, %v1277_v35  ;;  %v499_v35 = vadd.f32 %v1168_v13, %v1069_v27 }
 0x313   :  { %v730_v5 = vmul.f32 %v1287_v4, %v1279_v36 }
 0x315   :  { %v1289_v7 = vpop.eup %1288  ;;  %1185 = vmatprep.mubr.msk.f32.mxu0 %vm660_vm4, %v730_v5 }
 0x316   :  { %v1291_v8 = vpop.eup %1290  ;;  %1186 = vmatmul.mubr.msk.f32.vlgmr.msra.gmra.mrb[6].mxu0 %vm660_vm4, %v732_v6  ;;  %v736_v10 = vmul.f32 %v1289_v7, %v1281_v44  ;;  %v1082_v7 = vld [vmem:[%s1839_s13] ss:$0 sm:$0xff] }
 0x317   :  { %v734_v9 = vmul.f32 %v1291_v8, %v1283_v46  ;;  %1251 = vmatpush3.bf16.msra.mxu0 %v1250_v23 }
 0x318   :  { %1252 = vmatprep.subr.bf16.mxu0 %v1488_v24 }
 0x319   :  { %1188 = vmatprep.mubr.msk.f32.mxu0 %vm660_vm4, %v734_v9 }
 0x31a   :  { %1189 = vmatmul.mubr.msk.f32.gmra.mrb[8].mxu0 %vm660_vm4, %v736_v10 }
 0x31b   :  { %1210 = vmatprep.mubr.msk.f32.mxu0 %vm1489_vm1, %v1490_v34  ;;  %v869_v34 = vld [vmem:[%s1838_s12 + $0x10] sm:$0xff]  ;;  %1254 = vmatpush3.bf16.msra.mxu0 %v1253_v26 }
 0x31c   :  { %v1247_v19 = vpack.c.bf16 %v870_v18, %v869_v34 }
 0x31e   :  { %1248 = vmatpush3.bf16.msra.mxu1 %v1247_v19 }
 0x3e9   :  { %v1187_v30 = vpop.f32.mrb[6].mxu0 }
 0x3ea   :  { %v836_v31 = vmul.f32 %v1187_v30, %v489_v28  ;;  %v816_v32 = vpop.f32.mrb[7].mxu0 }
 0x3eb   :  { %v835_v33 = vmul.f32 %v816_v32, %v484_v29 }
 0x3ec   :  { %v846_v36 = vsel %vm165_vm2, %v836_v31, 0.0 }
 0x3ed   :  { %v847_v41 = vrot.slane %v846_v36, 4  ;;  %v839_v42 = vsel %vm165_vm2, %v835_v33, 0.0  ;;  %v1190_v43 = vpop.f32.mrb[8].mxu0 }
 0x3ee   :  { %v840_v44 = vrot.slane %v839_v42, 4  ;;  %v838_v45 = vmul.f32 %v1190_v43, %v499_v35  ;;  %v826_v46 = vpop.f32.mrb[9].mxu0 }
 0x3ef   :  { %v848_v24 = vadd.f32 %v847_v41, %v846_v36  ;;  %v837_v47 = vmul.f32 %v826_v46, %v494_v37 }
 0x3f0   :  { %v841_v48 = vadd.f32 %v840_v44, %v839_v42  ;;  %v860_v49 = vsel %vm165_vm2, %v838_v45, 0.0 }
 0x3f1   :  { %v849_v50 = vrot.slane %v848_v24, 2  ;;  %v861_v51 = vrot.slane %v860_v49, 4  ;;  %v853_v52 = vsel %vm165_vm2, %v837_v47, 0.0 }
 0x3f2   :  { %v842_v53 = vrot.slane %v841_v48, 2  ;;  %v854_v54 = vrot.slane %v853_v52, 4 }
 0x3f3   :  { %v850_v55 = vadd.f32 %v849_v50, %v848_v24  ;;  %v862_v56 = vadd.f32 %v861_v51, %v860_v49 }
 0x3f4   :  { %v843_v57 = vadd.f32 %v842_v53, %v841_v48  ;;  %v855_v38 = vadd.f32 %v854_v54, %v853_v52 }
 0x3f5   :  { %v851_v58 = vrot.slane %v850_v55, 1  ;;  %v863_v59 = vrot.slane %v862_v56, 2 }
 0x3f6   :  { %v844_v39 = vrot.slane %v843_v57, 1  ;;  %v856_v60 = vrot.slane %v855_v38, 2 }
 0x3f7   :  { %v852_v40 = vadd.f32 %v851_v58, %v850_v55  ;;  %v864_v61 = vadd.f32 %v863_v59, %v862_v56 }
 0x3f8   :  { %v845_v62 = vadd.f32 %v844_v39, %v843_v57  ;;  %v857_v63 = vadd.f32 %v856_v60, %v855_v38 }
 0x3f9   :  { %v865_v0 = vrot.slane %v864_v61, 1 }
 0x3fa   :  { %v882_v1 = vsel %vm224_vm3, %v852_v40, %v845_v62  ;;  %v858_v2 = vrot.slane %v857_v63, 1 }
 0x3fb   :  { %v866_v4 = vadd.f32 %v865_v0, %v864_v61 }
 0x3fc   :  { %v859_v3 = vadd.f32 %v858_v2, %v857_v63 }
 0x3fe   :  { %v884_v5 = vsel %vm883_vm5, %v859_v3, %v882_v1 }
 0x3ff   :  { %v886_v6 = vsel %vm885_vm6, %v866_v4, %v884_v5 }
 0x400   :  { %1200 = vmatmul.mubr.msk.f32.vlgmr.msra.gmra.mrb[8].mxu1 %vm165_vm2, %v886_v6 }
 0x4d3   :  { %v955_v8 = vpop.f32.mrb[8].mxu1 }
 0x4d4   :  { %v956_v9 = vadd.f32 %v1082_v7, %v955_v8  ;;  %v1201_v10 = vpop.f32.mrb[9].mxu1 }
 0x4d6   :  { %1211 = vmatmul.mubr.msk.f32.vlgmr.msra.gmra.mrb[10].mxu0 %vm165_vm2, %v956_v9 }
 0x5a9   :  { %v1039_v12 = vpop.f32.mrb[10].mxu0 }
 0x5aa   :  { %v1040_v13 = vadd.f32 %v1084_v11, %v1039_v12  ;;  %v1212_v14 = vpop.f32.mrb[11].mxu0 }
 0x5ac   :  { %1043 = vst [vmem:[#allocation14] sm:$0xf] %v1040_v13 }
 0x5ad   :  { %1457 = shalt.err (!%p1454_p4)
}
 0x5ae   :  { %s1458_s1 = scalar_lea.hbm %s1842_s16, 64 }
 0x5af   :  { %p1459_p5 = scmp.ne.s32.totalorder %s1842_s16, %s1458_s1  ;;  %p1462_p6 = scmp.lt.u32.totalorder %s1458_s1, %s1842_s16 }
 0x5b1   :  { %p1464_p7 = pnand %p1462_p6, %p1459_p5 }
 0x5b3   :  { %1467 = shalt.err (!%p1464_p7)
}
 0x5b4   :  { %1053 = dma.vmem_to_hbm [thread:$0]  %s1051_s22, 64, %s1842_s16, [#allocation4]  }
 0x5b5   :  { %1476 = dma.done.wait [#allocation4], 64  }
 0x5b6   :  { %1477 = vsyncadd [#allocation4], 4294967232 }
 0x5b7   :  { %1057 = vsyncpa [#allocation3], 1 }
 0x5b8   :  { %1058 = vsyncpa [#allocation6], 1 }
 0x5b9   :  { %1059 = vsyncpa [#allocation9], 1 }
 0x5ba   :  { %1060 = vsyncpa [#allocation12], 1 }
 0x5bb   :  { %1061 = vsyncpa [#allocation4], 1 }

</bundles_post_ra>
